<compile_context>
chip_gen: v7x
topology: tpu7x:2x2x1
jax: 0.10.0
libtpu: 0.0.40
codegen_flags: <defaults>
</compile_context>

<pallas_src>
import functools
import math

import jax
import jax.numpy as jnp
from jax.experimental import pallas as pl
from jax.experimental.pallas import tpu as pltpu

_LANES = 128


def _powsum(p, t, p_pow):
    """p^pow + t^pow with a repeated-multiply fast path for small integer pow."""
    if float(p_pow).is_integer() and 1 <= int(p_pow) <= 8:
        n = int(p_pow)
        pp, tp = p, t
        for _ in range(n - 1):
            pp = pp * p
            tp = tp * t
        return pp + tp
    # TODO(synk): non-integer / non-positive p falls back to transcendental pow.
    return jnp.power(p, jnp.float32(p_pow)) + jnp.power(t, jnp.float32(p_pow))


def _dice_kernel(p_ref, t_ref, num_out_ref, den_out_ref,
                 acc_num_ref, acc_den_ref, *,
                 blocks_per_split, rows_full, last_row_cols, p_pow):
    c = pl.program_id(0)            # parallel split (megacore axis)
    i = pl.program_id(1)            # reduction step within the split
    block_rows = p_ref.shape[0]

    @pl.when(i == 0)
    def _():
        acc_num_ref[...] = jnp.zeros_like(acc_num_ref)
        acc_den_ref[...] = jnp.zeros_like(acc_den_ref)

    # Validity mask from the *logical* block position: garbage rows of a ragged
    # last block, fully out-of-range (clamped) blocks, and the sub-128 tail of
    # the last row all contribute exactly zero (exact for any p).
    logical_block = c * blocks_per_split + i
    row0 = logical_block * block_rows
    row_ids = row0 + jax.lax.broadcasted_iota(jnp.int32, (block_rows, _LANES), 0)
    col_ids = jax.lax.broadcasted_iota(jnp.int32, (block_rows, _LANES), 1)
    mask = (row_ids < rows_full - 1) | (
        (row_ids == rows_full - 1) & (col_ids < last_row_cols))

    p = p_ref[...].astype(jnp.float32)
    t = t_ref[...].astype(jnp.float32)

    # Lane/sublane-parallel accumulation; no per-step scalar collapse.
    acc_num_ref[...] += jnp.where(mask, p * t, 0.0)
    acc_den_ref[...] += jnp.where(mask, _powsum(p, t, p_pow), 0.0)

    @pl.when(i == pl.num_programs(1) - 1)
    def _():
        num_out_ref[...] = jnp.broadcast_to(jnp.sum(acc_num_ref[...]),
                                            (1, 8, _LANES)).astype(jnp.float32)
        den_out_ref[...] = jnp.broadcast_to(jnp.sum(acc_den_ref[...]),
                                            (1, 8, _LANES)).astype(jnp.float32)


def binary_dice_loss(predict, target, smooth=1.0, p=2, *,
                     block_rows=4096, num_splits=2):
    assert predict.shape[0] == target.shape[0], "predict & target batch size don't match"
    total = math.prod(predict.shape)
    assert math.prod(target.shape) == total, "predict & target element counts must match"

    # Flatten to a lane-dense (rows, 128) slab. Contiguous reshapes are free;
    # at most 127 trailing elements get zero-padded (and are masked in-kernel).
    pred = predict.reshape(-1)
    targ = target.reshape(-1)
    rows_full = -(-total // _LANES)
    last_row_cols = total - (rows_full - 1) * _LANES
    padded = rows_full * _LANES
    if padded != total:
        pred = jnp.pad(pred, (0, padded - total))
        targ = jnp.pad(targ, (0, padded - total))
    pred = pred.reshape(rows_full, _LANES)
    targ = targ.reshape(rows_full, _LANES)

    # Block rows: multiple of 8, or the full (possibly small) row extent.
    if rows_full <= block_rows:
        block_rows = rows_full
    else:
        block_rows = max(8, (block_rows // 8) * 8)
    num_blocks = -(-rows_full // block_rows)
    num_splits = max(1, min(num_splits, num_blocks))
    bps = -(-num_blocks // num_splits)          # reduction length per split

    def in_map(c, i):
        # Clamp so the DMA never walks past the array; the kernel masks the
        # logically out-of-range duplicate block to zero contribution.
        return (jnp.minimum(c * bps + i, num_blocks - 1), 0)

    kernel = functools.partial(
        _dice_kernel, blocks_per_split=bps, rows_full=rows_full,
        last_row_cols=last_row_cols, p_pow=float(p))

    num_parts, den_parts = pl.pallas_call(
        kernel,
        out_shape=(jax.ShapeDtypeStruct((num_splits, 8, _LANES), jnp.float32),
                   jax.ShapeDtypeStruct((num_splits, 8, _LANES), jnp.float32)),
        grid_spec=pltpu.PrefetchScalarGridSpec(
            num_scalar_prefetch=0,
            grid=(num_splits, bps),
            in_specs=[pl.BlockSpec((block_rows, _LANES), in_map),
                      pl.BlockSpec((block_rows, _LANES), in_map)],
            out_specs=(pl.BlockSpec((1, 8, _LANES), lambda c, i: (c, 0, 0)),
                       pl.BlockSpec((1, 8, _LANES), lambda c, i: (c, 0, 0))),
            scratch_shapes=[pltpu.VMEM((block_rows, _LANES), jnp.float32),
                            pltpu.VMEM((block_rows, _LANES), jnp.float32)],
        ),
        compiler_params=pltpu.CompilerParams(
            dimension_semantics=("parallel", "arbitrary"),
            vmem_limit_bytes=32 * 1024 * 1024,
        ),
    )(pred, targ)

    # Tiny final combine (a handful of scalars) in plain JAX.
    num = 2.0 * jnp.sum(num_parts[:, 0, 0]) + jnp.float32(smooth)
    den = jnp.sum(den_parts[:, 0, 0]) + jnp.float32(smooth)
    return jnp.float32(1.0) - num / den


def binary_dice_loss_ref(predict, target, smooth=1.0, p=2):
    n = predict.shape[0]
    pred = predict.reshape(n, -1).astype(jnp.float32)
    targ = target.reshape(n, -1).astype(jnp.float32)
    num = jnp.sum(pred * targ) * 2.0 + smooth
    den = jnp.sum(jnp.power(pred, p) + jnp.power(targ, p)) + smooth
    return 1.0 - num / den


if __name__ == "__main__":
    key = jax.random.PRNGKey(0)
    k1, k2, k3, k4 = jax.random.split(key, 4)

    # Case 1: [N, C, H, W] float32, default tiling (single dense block).
    predict = jax.nn.sigmoid(jax.random.normal(k1, (2, 4, 16, 16), dtype=jnp.float32))
    target = (jax.random.uniform(k2, (2, 4, 16, 16)) > 0.5).astype(jnp.float32)
    loss = jax.block_until_ready(binary_dice_loss(predict, target, smooth=1.0, p=2))
    ref = binary_dice_loss_ref(predict, target, smooth=1.0, p=2)
    assert jnp.allclose(loss, ref, rtol=1e-5, atol=1e-5), (loss, ref)

    # Case 2: small block_rows forces multiple blocks, the 2-way parallel split,
    # a ragged (partial) last block, and a clamped out-of-range block.
    predict2 = jax.nn.sigmoid(jax.random.normal(k3, (2, 4, 16, 20), dtype=jnp.float32))
    target2 = (jax.random.uniform(k4, (2, 4, 16, 20)) > 0.5).astype(jnp.float32)
    loss2 = jax.block_until_ready(binary_dice_loss(predict2, target2, block_rows=8))
    ref2 = binary_dice_loss_ref(predict2, target2)
    assert jnp.allclose(loss2, ref2, rtol=1e-5, atol=1e-5), (loss2, ref2)

    # Case 3: bf16 inputs (no wrapper cast), total not a multiple of 128, p=3.
    predict3 = jax.nn.sigmoid(
        jax.random.normal(k1, (2, 3, 7, 5), dtype=jnp.float32)).astype(jnp.bfloat16)
    target3 = (jax.random.uniform(k2, (2, 3, 7, 5)) > 0.5).astype(jnp.bfloat16)
    loss3 = jax.block_until_ready(binary_dice_loss(predict3, target3, p=3))
    ref3 = binary_dice_loss_ref(predict3, target3, p=3)
    assert jnp.allclose(loss3, ref3, rtol=1e-4, atol=1e-4), (loss3, ref3)

    print("KERNEL_OK")
</pallas_src>

<mosaic_0001>
module attributes {stable_mosaic.version = 11 : i64} {
  func.func @_dice_kernel(%arg0: i32, %arg1: i32, %arg2: memref<16x128xf32, #tpu.memory_space<vmem>>, %arg3: memref<16x128xf32, #tpu.memory_space<vmem>>, %arg4: memref<1x8x128xf32, #tpu.memory_space<vmem>>, %arg5: memref<1x8x128xf32, #tpu.memory_space<vmem>>, %arg6: memref<16x128xf32, #tpu.memory_space<vmem>>, %arg7: memref<16x128xf32, #tpu.memory_space<vmem>>) attributes {dimension_semantics = [#tpu.dimension_semantics<parallel>, #tpu.dimension_semantics<arbitrary>], iteration_bounds = array<i64: 1, 1>, scalar_prefetch = 0 : i64, scratch_operands = 2 : i64, tpu.core_type = #tpu.core_type<tc>, window_params = [{transform_indices = @transform_0, window_bounds = array<i64: 16, 128>}, {transform_indices = @transform_1, window_bounds = array<i64: 16, 128>}, {transform_indices = @transform_2, window_bounds = array<i64: 1, 8, 128>}, {transform_indices = @transform_3, window_bounds = array<i64: 1, 8, 128>}]} {
    %c0_i32 = arith.constant 0 : i32
    %0 = arith.cmpi eq, %arg1, %c0_i32 : i32
    %1 = arith.extui %0 : i1 to i32
    %c0_i32_0 = arith.constant 0 : i32
    %2 = arith.cmpi ne, %1, %c0_i32_0 : i32
    scf.if %2 {
      %cst_16 = arith.constant 0.000000e+00 : f32
      %37 = vector.broadcast %cst_16 : f32 to vector<16x128xf32>
      %c0_17 = arith.constant 0 : index
      %c0_18 = arith.constant 0 : index
      %38 = vector.load %arg6[%c0_17, %c0_18] : memref<16x128xf32, #tpu.memory_space<vmem>>, vector<16x128xf32>
      tpu.vector_store %arg6[%c0_17, %c0_18], %37 {strides = array<i32>} : memref<16x128xf32, #tpu.memory_space<vmem>>, vector<16x128xf32>,
      %cst_19 = arith.constant 0.000000e+00 : f32
      %39 = vector.broadcast %cst_19 : f32 to vector<16x128xf32>
      %c0_20 = arith.constant 0 : index
      %c0_21 = arith.constant 0 : index
      %40 = vector.load %arg7[%c0_20, %c0_21] : memref<16x128xf32, #tpu.memory_space<vmem>>, vector<16x128xf32>
      tpu.vector_store %arg7[%c0_20, %c0_21], %39 {strides = array<i32>} : memref<16x128xf32, #tpu.memory_space<vmem>>, vector<16x128xf32>,
    } else {
    }
    %c1_i32 = arith.constant 1 : i32
    %3 = arith.muli %arg0, %c1_i32 : i32
    %4 = arith.addi %3, %arg1 : i32
    %c16_i32 = arith.constant 16 : i32
    %5 = arith.muli %4, %c16_i32 : i32
    %6 = tpu.iota {dimensions = array<i32: 0>} : vector<16x128xi32>
    %7 = vector.broadcast %5 : i32 to vector<16x128xi32>
    %8 = arith.addi %7, %6 : vector<16x128xi32>
    %9 = tpu.iota {dimensions = array<i32: 1>} : vector<16x128xi32>
    %c15_i32 = arith.constant 15 : i32
    %10 = vector.broadcast %c15_i32 : i32 to vector<16x128xi32>
    %11 = arith.cmpi slt, %8, %10 : vector<16x128xi32>
    %c15_i32_1 = arith.constant 15 : i32
    %12 = vector.broadcast %c15_i32_1 : i32 to vector<16x128xi32>
    %13 = arith.cmpi eq, %8, %12 : vector<16x128xi32>
    %c128_i32 = arith.constant 128 : i32
    %14 = vector.broadcast %c128_i32 : i32 to vector<16x128xi32>
    %15 = arith.cmpi slt, %9, %14 : vector<16x128xi32>
    %16 = arith.andi %13, %15 : vector<16x128xi1>
    %17 = arith.ori %11, %16 : vector<16x128xi1>
    %c0 = arith.constant 0 : index
    %c0_2 = arith.constant 0 : index
    %18 = vector.load %arg2[%c0, %c0_2] : memref<16x128xf32, #tpu.memory_space<vmem>>, vector<16x128xf32>
    %c0_3 = arith.constant 0 : index
    %c0_4 = arith.constant 0 : index
    %19 = vector.load %arg3[%c0_3, %c0_4] : memref<16x128xf32, #tpu.memory_space<vmem>>, vector<16x128xf32>
    %c0_5 = arith.constant 0 : index
    %c0_6 = arith.constant 0 : index
    %20 = vector.load %arg6[%c0_5, %c0_6] : memref<16x128xf32, #tpu.memory_space<vmem>>, vector<16x128xf32>
    %21 = arith.mulf %18, %19 : vector<16x128xf32>
    %cst = arith.constant 0.000000e+00 : f32
    %22 = vector.broadcast %cst : f32 to vector<16x128xf32>
    %23 = arith.select %17, %21, %22 : vector<16x128xi1>, vector<16x128xf32>
    %24 = arith.addf %20, %23 : vector<16x128xf32>
    %c0_7 = arith.constant 0 : index
    %c0_8 = arith.constant 0 : index
    %25 = vector.load %arg6[%c0_7, %c0_8] : memref<16x128xf32, #tpu.memory_space<vmem>>, vector<16x128xf32>
    tpu.vector_store %arg6[%c0_7, %c0_8], %24 {strides = array<i32>} : memref<16x128xf32, #tpu.memory_space<vmem>>, vector<16x128xf32>,
    %c0_9 = arith.constant 0 : index
    %c0_10 = arith.constant 0 : index
    %26 = vector.load %arg7[%c0_9, %c0_10] : memref<16x128xf32, #tpu.memory_space<vmem>>, vector<16x128xf32>
    %27 = arith.mulf %18, %18 : vector<16x128xf32>
    %28 = arith.mulf %19, %19 : vector<16x128xf32>
    %29 = arith.addf %27, %28 : vector<16x128xf32>
    %cst_11 = arith.constant 0.000000e+00 : f32
    %30 = vector.broadcast %cst_11 : f32 to vector<16x128xf32>
    %31 = arith.select %17, %29, %30 : vector<16x128xi1>, vector<16x128xf32>
    %32 = arith.addf %26, %31 : vector<16x128xf32>
    %c0_12 = arith.constant 0 : index
    %c0_13 = arith.constant 0 : index
    %33 = vector.load %arg7[%c0_12, %c0_13] : memref<16x128xf32, #tpu.memory_space<vmem>>, vector<16x128xf32>
    tpu.vector_store %arg7[%c0_12, %c0_13], %32 {strides = array<i32>} : memref<16x128xf32, #tpu.memory_space<vmem>>, vector<16x128xf32>,
    %c0_i32_14 = arith.constant 0 : i32
    %34 = arith.cmpi eq, %arg1, %c0_i32_14 : i32
    %35 = arith.extui %34 : i1 to i32
    %c0_i32_15 = arith.constant 0 : i32
    %36 = arith.cmpi ne, %35, %c0_i32_15 : i32
    scf.if %36 {
      %c0_16 = arith.constant 0 : index
      %c0_17 = arith.constant 0 : index
      %37 = vector.load %arg6[%c0_16, %c0_17] : memref<16x128xf32, #tpu.memory_space<vmem>>, vector<16x128xf32>
      %38 = vector.shape_cast %37 : vector<16x128xf32> to vector<1x16x128xf32>
      %cst_18 = arith.constant dense<0.000000e+00> : vector<1xf32>
      %39 = vector.multi_reduction <add>, %38, %cst_18 [1, 2] : vector<1x16x128xf32> to vector<1xf32>
      %40 = vector.shape_cast %39 : vector<1xf32> to vector<1x1x1xf32>
      %41 = vector.extract %40[0, 0, 0] : f32 from vector<1x1x1xf32>
      %42 = vector.broadcast %41 : f32 to vector<1x8x128xf32>
      %c0_19 = arith.constant 0 : index
      %c0_20 = arith.constant 0 : index
      %c0_21 = arith.constant 0 : index
      %43 = vector.load %arg4[%c0_19, %c0_20, %c0_21] : memref<1x8x128xf32, #tpu.memory_space<vmem>>, vector<1x8x128xf32>
      tpu.vector_store %arg4[%c0_19, %c0_20, %c0_21], %42 {strides = array<i32>} : memref<1x8x128xf32, #tpu.memory_space<vmem>>, vector<1x8x128xf32>,
      %c0_22 = arith.constant 0 : index
      %c0_23 = arith.constant 0 : index
      %44 = vector.load %arg7[%c0_22, %c0_23] : memref<16x128xf32, #tpu.memory_space<vmem>>, vector<16x128xf32>
      %45 = vector.shape_cast %44 : vector<16x128xf32> to vector<1x16x128xf32>
      %cst_24 = arith.constant dense<0.000000e+00> : vector<1xf32>
      %46 = vector.multi_reduction <add>, %45, %cst_24 [1, 2] : vector<1x16x128xf32> to vector<1xf32>
      %47 = vector.shape_cast %46 : vector<1xf32> to vector<1x1x1xf32>
      %48 = vector.extract %47[0, 0, 0] : f32 from vector<1x1x1xf32>
      %49 = vector.broadcast %48 : f32 to vector<1x8x128xf32>
      %c0_25 = arith.constant 0 : index
      %c0_26 = arith.constant 0 : index
      %c0_27 = arith.constant 0 : index
      %50 = vector.load %arg5[%c0_25, %c0_26, %c0_27] : memref<1x8x128xf32, #tpu.memory_space<vmem>>, vector<1x8x128xf32>
      tpu.vector_store %arg5[%c0_25, %c0_26, %c0_27], %49 {strides = array<i32>} : memref<1x8x128xf32, #tpu.memory_space<vmem>>, vector<1x8x128xf32>,
    } else {
    }
    return
  }
  func.func @transform_0(%arg0: i32, %arg1: i32) -> (i32, i32) {
    %c1_i32 = arith.constant 1 : i32
    %0 = arith.muli %arg0, %c1_i32 : i32
    %1 = arith.addi %0, %arg1 : i32
    %c0_i32 = arith.constant 0 : i32
    %2 = arith.minsi %1, %c0_i32 : i32
    %c0_i32_0 = arith.constant 0 : i32
    %c0_i32_1 = arith.constant 0 : i32
    return %2, %c0_i32_0 : i32, i32
  }
  func.func @transform_1(%arg0: i32, %arg1: i32) -> (i32, i32) {
    %c1_i32 = arith.constant 1 : i32
    %0 = arith.muli %arg0, %c1_i32 : i32
    %1 = arith.addi %0, %arg1 : i32
    %c0_i32 = arith.constant 0 : i32
    %2 = arith.minsi %1, %c0_i32 : i32
    %c0_i32_0 = arith.constant 0 : i32
    %c0_i32_1 = arith.constant 0 : i32
    return %2, %c0_i32_0 : i32, i32
  }
  func.func @transform_2(%arg0: i32, %arg1: i32) -> (i32, i32, i32) {
    %c0_i32 = arith.constant 0 : i32
    %c0_i32_0 = arith.constant 0 : i32
    %c0_i32_1 = arith.constant 0 : i32
    return %arg0, %c0_i32, %c0_i32_0 : i32, i32, i32
  }
  func.func @transform_3(%arg0: i32, %arg1: i32) -> (i32, i32, i32) {
    %c0_i32 = arith.constant 0 : i32
    %c0_i32_0 = arith.constant 0 : i32
    %c0_i32_1 = arith.constant 0 : i32
    return %arg0, %c0_i32, %c0_i32_0 : i32, i32, i32
  }
}

</mosaic_0001>

<bundles_post_ra>
// kernel: tpu_custom_call.1
= control target key start
LH: loop header
LB: loop body
LE: loop exit
PB: predicated region body
PF: predicated region fallthrough
CT: control target
= control target key end

     0   :  { %9 = vsyncpa [#allocation5], 0  ;;  %s363_s0 = inlined_call_operand.hbm [shape: f32[16,128], index: 0, kind: input, shape index: {}]   ;;  %s364_s1 = inlined_call_operand.hbm [shape: f32[16,128], index: 1, kind: input, shape index: {}]   ;;  %s365_s2 = inlined_call_operand.hbm [shape: f32[1,8,128], index: 2, kind: output, shape index: {0}]   ;;  %s366_s3 = inlined_call_operand.hbm [shape: f32[1,8,128], index: 3, kind: output, shape index: {1}]  }
   0x1   :  { %10 = vsyncpa [#allocation8], 0 }
   0x2   :  { %11 = vsyncpa [#allocation6], 0 }
   0x3   :  { %12 = vsyncpa [#allocation11], 0  ;;  %s289_s12 = smov [#allocation4]   ;;  %s193_s16 = scalar_lea.hbm %s363_s0, 256 }
   0x4   :  { %s24_s13 = sshll.u32 %s289_s12, 4  ;;  %p194_p0 = scmp.ne.s32.totalorder %s363_s0, %s193_s16  ;;  %s25_s13 = int_to_ptr.vmem [resolvable:$true] %s24_s13 }
   0x5   :  { %p197_p1 = scmp.lt.u32.totalorder %s193_s16, %s363_s0 }
   0x7   :  { %p199_p2 = pnand %p197_p1, %p194_p0 }
   0x9   :  { %202 = shalt.err (!%p199_p2)
}
   0xa   :  { %s203_s21 = scalar_lea.vmem %s25_s13, 256  ;;  %p208_p4 = scmp.lt.s32.totalorder %s25_s13, %s25_s13 }
   0xb   :  { %p204_p3 = scmp.ne.s32.totalorder %s25_s13, %s203_s21  ;;  %p209_p5 = scmp.lt.s32.totalorder %s203_s21, %s203_s21 }
   0xd   :  { %p210_p6 = por %p209_p5, %p208_p4 }
   0xf   :  { %p211_p7 = pnand %p210_p6, %p204_p3 }
  0x11   :  { %214 = shalt.err (!%p211_p7)
}
  0x12   :  { %s290_s22 = smov 128   ;;  %s291_s23 = smov 8  }
  0x13   :  { %30 = dma.hbm_to_vmem [thread:$0]  %s363_s0, 256, %s25_s13, [#allocation5], %s290_s22, %s290_s22, %s291_s23  }
  0x14   :  { %s292_s26 = smov [#allocation7]   ;;  %s215_s30 = scalar_lea.hbm %s364_s1, 256 }
  0x15   :  { %s42_s27 = sshll.u32 %s292_s26, 4  ;;  %p216_p8 = scmp.ne.s32.totalorder %s364_s1, %s215_s30  ;;  %s43_s27 = int_to_ptr.vmem [resolvable:$true] %s42_s27 }
  0x16   :  { %p219_p9 = scmp.lt.u32.totalorder %s215_s30, %s364_s1 }
  0x18   :  { %p221_p10 = pnand %p219_p9, %p216_p8 }
  0x1a   :  { %224 = shalt.err (!%p221_p10)
}
  0x1b   :  { %s225_s8 = scalar_lea.vmem %s43_s27, 256  ;;  %p230_p12 = scmp.lt.s32.totalorder %s43_s27, %s43_s27 }
  0x1c   :  { %p226_p11 = scmp.ne.s32.totalorder %s43_s27, %s225_s8  ;;  %p231_p13 = scmp.lt.s32.totalorder %s225_s8, %s225_s8 }
  0x1e   :  { %p232_p0 = por %p231_p13, %p230_p12 }
  0x20   :  { %p233_p1 = pnand %p232_p0, %p226_p11 }
  0x22   :  { %236 = shalt.err (!%p233_p1)
}
  0x23   :  { %48 = dma.hbm_to_vmem [thread:$0]  %s364_s1, 256, %s43_s27, [#allocation8], %s290_s22, %s290_s22, %s291_s23  }
  0x24   :  { %281 = dma.done.wait [#allocation5], 256  }
  0x25   :  { %282 = vsyncadd [#allocation5], 4294967040 }
  0x26   :  { %283 = dma.done.wait [#allocation8], 256  }
  0x27   :  { %284 = vsyncadd [#allocation8], 4294967040  ;;  %v73_v0 = vlaneseq  ;;  %v90_v3 = vld [vmem:[#allocation4] sm:$0xff]  ;;  %v91_v4 = vld [vmem:[#allocation4 + $0x8] sm:$0xff]  ;;  %s293_s1 = smov [#allocation9]   ;;  %s294_s12 = smov [#allocation10]  }
  0x28   :  { %v92_v5 = vld [vmem:[#allocation7] sm:$0xff]  ;;  %v93_v6 = vld [vmem:[#allocation7 + $0x8] sm:$0xff]  ;;  %v106_v7 = vmul.f32 %v90_v3, %v90_v3  ;;  %v107_v8 = vmul.f32 %v91_v4, %v91_v4  ;;  %s155_s10 = sshll.u32 %s293_s1, 4  ;;  %s165_s13 = sshll.u32 %s294_s12, 4  ;;  %s156_s10 = int_to_ptr.vmem [resolvable:$true] %s155_s10  ;;  %s166_s13 = int_to_ptr.vmem [resolvable:$true] %s165_s13 }
  0x29   :  { %v74_v1 = vshrl.u32 %v73_v0, 7  ;;  %v96_v9 = vmul.f32 %v92_v5, %v90_v3  ;;  %v97_v10 = vmul.f32 %v93_v6, %v91_v4  ;;  %v108_v11 = vmul.f32 %v92_v5, %v92_v5  ;;  %s237_s14 = scalar_lea.vmem %s156_s10, 128  ;;  %p242_p3 = scmp.lt.s32.totalorder %s156_s10, %s156_s10 }
  0x2a   :  { %v109_v12 = vmul.f32 %v93_v6, %v93_v6  ;;  %p238_p2 = scmp.ne.s32.totalorder %s156_s10, %s237_s14  ;;  %p243_p4 = scmp.lt.s32.totalorder %s237_s14, %s237_s14 }
  0x2b   :  { %v75_v2 = vadd.s32 8, %v74_v1  ;;  %v110_v14 = vadd.f32 %v108_v11, %v106_v7 }
  0x2c   :  { %v111_v15 = vadd.f32 %v109_v12, %v107_v8  ;;  %p244_p5 = por %p243_p4, %p242_p3 }
  0x2d   :  { %vm82_vm0 = vcmp.lt.s32.totalorder %v75_v2, 15  ;;  %vm84_vm1 = vcmp.eq.s32.totalorder %v75_v2, 15 }
  0x2e   :  { %vm89_vm2 = vmor %vm82_vm0, %vm84_vm1  ;;  %p245_p6 = pnand %p244_p5, %p238_p2 }
  0x2f   :  { %v99_v13 = vsel %vm89_vm2, %v97_v10, 0.0  ;;  %v113_v17 = vsel %vm89_vm2, %v111_v15, 0.0 }
  0x30   :  { %v123_v16 = vadd.f32 %v99_v13, %v96_v9  ;;  %v137_v18 = vadd.f32 %v113_v17, %v110_v14 }
  0x32   :  { %124 = vadd.xlane.f32.xlu0 %v123_v16 }
  0x36   :  { %138 = vadd.xlane.f32.xlu0 %v137_v18 }
  0xbf   :  { %v125_v19 = vpop.xlane.xlu0 %124 }
  0xc0   :  { %v126_v20 = vrot.slane %v125_v19, 4 }
  0xc2   :  { %v127_v21 = vadd.f32 %v126_v20, %v125_v19 }
  0xc3   :  { %v139_v22 = vpop.xlane.xlu0 %138 }
  0xc4   :  { %v128_v23 = vrot.slane %v127_v21, 2  ;;  %v140_v24 = vrot.slane %v139_v22, 4 }
  0xc6   :  { %v141_v25 = vadd.f32 %v140_v24, %v139_v22  ;;  %v129_v26 = vadd.f32 %v128_v23, %v127_v21 }
  0xc8   :  { %v142_v27 = vrot.slane %v141_v25, 2  ;;  %v130_v28 = vrot.slane %v129_v26, 1 }
  0xca   :  { %v143_v29 = vadd.f32 %v142_v27, %v141_v25  ;;  %v131_v30 = vadd.f32 %v130_v28, %v129_v26 }
  0xcc   :  { %183 = vpush %v131_v30  ;;  %v144_v31 = vrot.slane %v143_v29, 1 }
  0xce   :  { %v145_v32 = vadd.f32 %v144_v31, %v143_v29 }
  0xd0   :  { %185 = vpush %v145_v32 }
  0xfd   :  { %s184_s11 = spop %183 }
  0xfe   :  { %v133_v33 = vstv %s184_s11 }
  0xff   :  { %134 = vst [vmem:[#allocation9] sm:$0xff] %v133_v33 }
 0x100   :  { %248 = shalt.err (!%p245_p6)
}
 0x101   :  { %s249_s17 = scalar_lea.hbm %s365_s2, 128 }
 0x102   :  { %p250_p7 = scmp.ne.s32.totalorder %s365_s2, %s249_s17  ;;  %p253_p8 = scmp.lt.u32.totalorder %s249_s17, %s365_s2 }
 0x104   :  { %p255_p9 = pnand %p253_p8, %p250_p7 }
 0x106   :  { %258 = shalt.err (!%p255_p9)
}
 0x107   :  { %158 = dma.vmem_to_hbm [thread:$0]  %s156_s10, 128, %s365_s2, [#allocation6]  }
 0x108   :  { %s186_s24 = spop %185  ;;  %s259_s25 = scalar_lea.vmem %s166_s13, 128 }
 0x109   :  { %v147_v34 = vstv %s186_s24  ;;  %p260_p10 = scmp.ne.s32.totalorder %s166_s13, %s259_s25  ;;  %p264_p11 = scmp.lt.s32.totalorder %s166_s13, %s166_s13 }
 0x10a   :  { %148 = vst [vmem:[#allocation10] sm:$0xff] %v147_v34  ;;  %p265_p12 = scmp.lt.s32.totalorder %s259_s25, %s259_s25 }
 0x10c   :  { %p266_p13 = por %p265_p12, %p264_p11 }
 0x10e   :  { %p267_p0 = pnand %p266_p13, %p260_p10 }
 0x110   :  { %270 = shalt.err (!%p267_p0)
}
 0x111   :  { %s271_s28 = scalar_lea.hbm %s366_s3, 128 }
 0x112   :  { %p272_p1 = scmp.ne.s32.totalorder %s366_s3, %s271_s28  ;;  %p275_p2 = scmp.lt.u32.totalorder %s271_s28, %s366_s3 }
 0x114   :  { %p277_p3 = pnand %p275_p2, %p272_p1 }
 0x116   :  { %280 = shalt.err (!%p277_p3)
}
 0x117   :  { %168 = dma.vmem_to_hbm [thread:$0]  %s166_s13, 128, %s366_s3, [#allocation11]  }
 0x118   :  { %285 = dma.done.wait [#allocation6], 128  }
 0x119   :  { %286 = vsyncadd [#allocation6], 4294967168 }
 0x11a   :  { %287 = dma.done.wait [#allocation11], 128  }
 0x11b   :  { %288 = vsyncadd [#allocation11], 4294967168 }
 0x11c   :  { %175 = vsyncpa [#allocation5], 1 }
 0x11d   :  { %176 = vsyncpa [#allocation8], 1 }
 0x11e   :  { %177 = vsyncpa [#allocation6], 1 }
 0x11f   :  { %178 = vsyncpa [#allocation11], 1 }

</bundles_post_ra>
